<compile_context>
chip_gen: v7x
topology: tpu7x:2x2x1
jax: 0.10.0
libtpu: 0.0.40
codegen_flags: <defaults>
</compile_context>

<pallas_src>
import numpy as np
import jax
import jax.numpy as jnp
from jax import lax
from jax.experimental import pallas as pl
from jax.experimental.pallas import tpu as pltpu


def features_linear_kernel(xt_ref, wt_ref, b_ref, ot_ref):
    # xt_ref: (F, TB)  int32   offset-adjusted indices, batch on the lane axis
    # wt_ref: (D, V)   float32 transposed embedding table (VMEM-resident)
    # b_ref:  (D, 1)   float32 bias
    # ot_ref: (D, TB)  float32 transposed output tile (lane-dense)
    idx = xt_ref[...]                                       # (F, TB)
    num_fields, tb = idx.shape
    vocab = wt_ref.shape[1]

    # counts[v, b] = #{f : idx[f, b] == v}; sublane iota over vocab, batch on lanes.
    vrow = lax.broadcasted_iota(jnp.int32, (vocab, tb), 0)  # (V, TB)
    counts = jnp.zeros((vocab, tb), dtype=jnp.float32)
    for f in range(num_fields):                             # small static field loop
        counts = counts + (idx[f:f + 1, :] == vrow).astype(jnp.float32)

    # sum of gathered embedding rows == W^T @ counts  -> (D, TB), lane-dense output.
    acc = jnp.dot(wt_ref[...], counts, preferred_element_type=jnp.float32)
    ot_ref[...] = acc + b_ref[...]


def features_linear(x, offsets, weight, bias, *, tb=128):
    """x: (B, F) int, offsets: (F,) int, weight: (V, D) f32, bias: (D,) f32 -> (B, D) f32."""
    B, F = x.shape
    V, D = weight.shape
    assert V < 2**31, "flat vocabulary must fit in int32"

    # Fold per-field offsets into the indices (XLA-side) and clamp to the table.
    # (torch.nn.Embedding errors on OOB; clamping keeps in-kernel reads in-bounds.)
    idx = x.astype(jnp.int32) + offsets.astype(jnp.int32)[None, :]
    idx = jnp.clip(idx, 0, V - 1)

    # Pad the batch to a multiple of the lane-sized tile and transpose so batch
    # maps to lanes inside the kernel; padded rows are sliced off afterwards.
    B_pad = ((B + tb - 1) // tb) * tb
    if B_pad != B:
        idx = jnp.pad(idx, ((0, B_pad - B), (0, 0)))
    xt = idx.T                                              # (F, B_pad)

    wt = weight.astype(jnp.float32).T                       # (D, V)  layout plumbing in wrapper
    b2d = bias.astype(jnp.float32).reshape(D, 1)            # (D, 1)

    out_t = pl.pallas_call(
        features_linear_kernel,
        out_shape=jax.ShapeDtypeStruct((D, B_pad), jnp.float32),
        grid=(B_pad // tb,),
        in_specs=[
            pl.BlockSpec((F, tb), lambda i: (0, i)),        # index tile (batch on lanes)
            pl.BlockSpec((D, V), lambda i: (0, 0)),         # resident transposed table
            pl.BlockSpec((D, 1), lambda i: (0, 0)),         # bias
        ],
        out_specs=pl.BlockSpec((D, tb), lambda i: (0, i)),  # lane-dense (D, TB) block
        compiler_params=pltpu.CompilerParams(
            dimension_semantics=("parallel",),              # pipelining + megacore sharding
            vmem_limit_bytes=32 * 1024 * 1024,              # well under v5e/v6e/v7x physical VMEM
        ),
    )(xt, wt, b2d)

    return out_t[:, :B].T                                   # (B, D)


if __name__ == "__main__":
    # Module config (synthetic, deterministic, small).
    field_dims = np.array([3, 5, 7, 9], dtype=np.int32)     # vocab sizes per field
    output_dim = 1
    vocab = int(field_dims.sum())                           # 24
    num_fields = len(field_dims)                            # 4
    batch = 8

    # offsets = (0, cumsum(field_dims)[:-1])
    offsets = jnp.asarray(np.array((0, *np.cumsum(field_dims)[:-1]), dtype=np.int32))

    key = jax.random.PRNGKey(0)
    k_w, k_x = jax.random.split(key)
    weight = jax.random.normal(k_w, (vocab, output_dim), dtype=jnp.float32)
    bias = jnp.zeros((output_dim,), dtype=jnp.float32)      # torch init: zeros

    # Per-field indices in [0, field_dims[f]).
    u = jax.random.uniform(k_x, (batch, num_fields))
    x = jnp.floor(u * jnp.asarray(field_dims, dtype=jnp.float32)).astype(jnp.int32)

    out = features_linear(x, offsets, weight, bias)
    out = jax.block_until_ready(out)

    # Pure-JAX reference for correctness.
    ref = jnp.take(weight, x + offsets[None, :], axis=0).sum(axis=1) + bias
    np.testing.assert_allclose(np.asarray(out), np.asarray(ref), rtol=1e-6, atol=1e-6)

    print("KERNEL_OK")
</pallas_src>

<mosaic_0001>
module attributes {stable_mosaic.version = 11 : i64} {
  func.func @features_linear_kernel(%arg0: i32, %arg1: memref<4x128xi32, #tpu.memory_space<vmem>>, %arg2: memref<1x24xf32, #tpu.memory_space<vmem>>, %arg3: memref<1x1xf32, #tpu.memory_space<vmem>>, %arg4: memref<1x128xf32, #tpu.memory_space<vmem>>) attributes {dimension_semantics = [#tpu.dimension_semantics<parallel>], iteration_bounds = array<i64: 1>, scalar_prefetch = 0 : i64, scratch_operands = 0 : i64, tpu.core_type = #tpu.core_type<tc>, window_params = [{transform_indices = @transform_0, window_bounds = array<i64: 4, 128>}, {pipeline_mode = #tpu.pipeline_mode<synchronous>, transform_indices = @transform_1, window_bounds = array<i64: 1, 24>}, {pipeline_mode = #tpu.pipeline_mode<synchronous>, transform_indices = @transform_2, window_bounds = array<i64: 1, 1>}, {transform_indices = @transform_3, window_bounds = array<i64: 1, 128>}]} {
    %c0 = arith.constant 0 : index
    %c0_0 = arith.constant 0 : index
    %0 = vector.load %arg1[%c0, %c0_0] : memref<4x128xi32, #tpu.memory_space<vmem>>, vector<4x128xi32>
    %1 = tpu.iota {dimensions = array<i32: 0>} : vector<24x128xi32>
    %cst = arith.constant 0.000000e+00 : f32
    %2 = vector.broadcast %cst : f32 to vector<24x128xf32>
    %3 = vector.extract_strided_slice %0 {offsets = [0, 0], sizes = [1, 128], strides = [1, 1]} : vector<4x128xi32> to vector<1x128xi32>
    %4 = vector.broadcast %3 : vector<1x128xi32> to vector<24x128xi32>
    %5 = arith.cmpi eq, %4, %1 : vector<24x128xi32>
    %6 = arith.extui %5 : vector<24x128xi1> to vector<24x128xi32>
    %7 = arith.sitofp %6 : vector<24x128xi32> to vector<24x128xf32>
    %8 = arith.addf %2, %7 : vector<24x128xf32>
    %9 = vector.extract_strided_slice %0 {offsets = [1, 0], sizes = [1, 128], strides = [1, 1]} : vector<4x128xi32> to vector<1x128xi32>
    %10 = vector.broadcast %9 : vector<1x128xi32> to vector<24x128xi32>
    %11 = arith.cmpi eq, %10, %1 : vector<24x128xi32>
    %12 = arith.extui %11 : vector<24x128xi1> to vector<24x128xi32>
    %13 = arith.sitofp %12 : vector<24x128xi32> to vector<24x128xf32>
    %14 = arith.addf %8, %13 : vector<24x128xf32>
    %15 = vector.extract_strided_slice %0 {offsets = [2, 0], sizes = [1, 128], strides = [1, 1]} : vector<4x128xi32> to vector<1x128xi32>
    %16 = vector.broadcast %15 : vector<1x128xi32> to vector<24x128xi32>
    %17 = arith.cmpi eq, %16, %1 : vector<24x128xi32>
    %18 = arith.extui %17 : vector<24x128xi1> to vector<24x128xi32>
    %19 = arith.sitofp %18 : vector<24x128xi32> to vector<24x128xf32>
    %20 = arith.addf %14, %19 : vector<24x128xf32>
    %21 = vector.extract_strided_slice %0 {offsets = [3, 0], sizes = [1, 128], strides = [1, 1]} : vector<4x128xi32> to vector<1x128xi32>
    %22 = vector.broadcast %21 : vector<1x128xi32> to vector<24x128xi32>
    %23 = arith.cmpi eq, %22, %1 : vector<24x128xi32>
    %24 = arith.extui %23 : vector<24x128xi1> to vector<24x128xi32>
    %25 = arith.sitofp %24 : vector<24x128xi32> to vector<24x128xf32>
    %26 = arith.addf %20, %25 : vector<24x128xf32>
    %c0_1 = arith.constant 0 : index
    %c0_2 = arith.constant 0 : index
    %27 = vector.load %arg2[%c0_1, %c0_2] : memref<1x24xf32, #tpu.memory_space<vmem>>, vector<1x24xf32>
    %cst_3 = arith.constant dense<0.000000e+00> : vector<1x128xf32>
    %28 = tpu.matmul %27, %26, %cst_3 {dimension_numbers = #tpu.dot_dimension_numbers<[1], [0], [0], [1], [0, 0, 1, 1], [], []>} : vector<1x24xf32>, vector<24x128xf32>, vector<1x128xf32> -> vector<1x128xf32>
    %c0_4 = arith.constant 0 : index
    %c0_5 = arith.constant 0 : index
    %29 = vector.load %arg3[%c0_4, %c0_5] : memref<1x1xf32, #tpu.memory_space<vmem>>, vector<1x1xf32>
    %30 = vector.broadcast %29 : vector<1x1xf32> to vector<1x128xf32>
    %31 = arith.addf %28, %30 : vector<1x128xf32>
    %c0_6 = arith.constant 0 : index
    %c0_7 = arith.constant 0 : index
    %32 = vector.load %arg4[%c0_6, %c0_7] : memref<1x128xf32, #tpu.memory_space<vmem>>, vector<1x128xf32>
    tpu.vector_store %arg4[%c0_6, %c0_7], %31 {strides = array<i32>} : memref<1x128xf32, #tpu.memory_space<vmem>>, vector<1x128xf32>,
    return
  }
  func.func @transform_0(%arg0: i32) -> (i32, i32) {
    %c0_i32 = arith.constant 0 : i32
    %c0_i32_0 = arith.constant 0 : i32
    return %c0_i32, %arg0 : i32, i32
  }
  func.func @transform_1(%arg0: i32) -> (i32, i32) {
    %c0_i32 = arith.constant 0 : i32
    %c0_i32_0 = arith.constant 0 : i32
    %c0_i32_1 = arith.constant 0 : i32
    return %c0_i32, %c0_i32_0 : i32, i32
  }
  func.func @transform_2(%arg0: i32) -> (i32, i32) {
    %c0_i32 = arith.constant 0 : i32
    %c0_i32_0 = arith.constant 0 : i32
    %c0_i32_1 = arith.constant 0 : i32
    return %c0_i32, %c0_i32_0 : i32, i32
  }
  func.func @transform_3(%arg0: i32) -> (i32, i32) {
    %c0_i32 = arith.constant 0 : i32
    %c0_i32_0 = arith.constant 0 : i32
    return %c0_i32, %arg0 : i32, i32
  }
}

</mosaic_0001>

<bundles_post_ra>
// kernel: tpu_custom_call.1
= control target key start
LH: loop header
LB: loop body
LE: loop exit
PB: predicated region body
PF: predicated region fallthrough
CT: control target
= control target key end

     0   :  { %s339_s0 = inlined_call_operand.hbm [shape: s32[4,128], index: 0, kind: input, shape index: {}]   ;;  %s340_s1 = inlined_call_operand.vmem [shape: f32[1,24], index: 1, kind: input, shape index: {}]   ;;  %s341_s2 = inlined_call_operand.<no memory space> [shape: f32[1,1], index: 2, kind: input, shape index: {}]   ;;  %s342_s3 = inlined_call_operand.hbm [shape: f32[1,128], index: 3, kind: output, shape index: {}]  }
   0x1   :  { %v8_v0 = vstv %s341_s2 }
   0x2   :  { %9 = vst [vmem:[#allocation2] sm:$0x1] %v8_v0 }
   0x3   :  { %10 = vsyncpa [#allocation4], 0 }
   0x4   :  { %11 = vsyncpa [#allocation5], 0  ;;  %s283_s14 = smov [#allocation3]   ;;  %s235_s18 = scalar_lea.hbm %s339_s0, 64 }
   0x5   :  { %s18_s15 = sshll.u32 %s283_s14, 4  ;;  %p236_p0 = scmp.ne.s32.totalorder %s339_s0, %s235_s18  ;;  %s19_s15 = int_to_ptr.vmem [resolvable:$true] %s18_s15 }
   0x6   :  { %p239_p1 = scmp.lt.u32.totalorder %s235_s18, %s339_s0 }
   0x8   :  { %p241_p2 = pnand %p239_p1, %p236_p0 }
   0xa   :  { %244 = shalt.err (!%p241_p2)
}
   0xb   :  { %s245_s2 = scalar_lea.vmem %s19_s15, 64  ;;  %p250_p4 = scmp.lt.s32.totalorder %s19_s15, %s19_s15 }
   0xc   :  { %p246_p3 = scmp.ne.s32.totalorder %s19_s15, %s245_s2  ;;  %p251_p5 = scmp.lt.s32.totalorder %s245_s2, %s245_s2 }
   0xe   :  { %p252_p6 = por %p251_p5, %p250_p4 }
  0x10   :  { %p253_p7 = pnand %p252_p6, %p246_p3 }
  0x12   :  { %256 = shalt.err (!%p253_p7)
}
  0x13   :  { %21 = dma.hbm_to_vmem [thread:$0]  %s339_s0, 64, %s19_s15, [#allocation4]  }
  0x14   :  { %279 = dma.done.wait [#allocation4], 64  }
  0x15   :  { %280 = vsyncadd [#allocation4], 4294967232  ;;  %v30_v1 = vlaneseq  ;;  %v284_v2 = vmov 0.0|0.0   ;;  %vm285_vm0 = vmmov 0   ;;  %v286_v3 = vmov 0.0   ;;  %s288_s26 = smov [#allocation6]  }
  0x16   :  { %225 = vmatprep.subr.bf16.mxu0 %v284_v2  ;;  %222 = vmatprep.mubr.msk.f32.mxu0 %vm285_vm0, %v286_v3  ;;  %v287_v5 = vmov 0   ;;  %v29_v11 = vld [vmem:[#allocation3] sm:$0xf]  ;;  %v99_v12 = vld [vmem:[#allocation2] sm:$0x1]  ;;  %vm109_vm13 = vcmask 195584  }
  0x17   :  { %v31_v4 = vshrl.u32 %v30_v1, 7  ;;  %234 = vset.pattern.permute.xlu0 %v287_v5  ;;  %v98_v40 = vld [vmem:[%s340_s1] sm:$0x1]  ;;  %s190_s27 = sshll.u32 %s288_s26, 4  ;;  %s191_s27 = int_to_ptr.vmem [resolvable:$true] %s190_s27 }
  0x18   :  { %102 = vperm.xlu0 %234, %v99_v12   ;;  %s257_s28 = scalar_lea.vmem %s191_s27, 16  ;;  %s261_s29 = scalar_lea.vmem %s191_s27, 32 }
  0x19   :  { %v36_v6 = vsub.s32 0, %v31_v4  ;;  %v52_v7 = vsub.s32 1, %v31_v4  ;;  %v68_v8 = vsub.s32 2, %v31_v4  ;;  %v84_v9 = vsub.s32 3, %v31_v4  ;;  %p258_p8 = scmp.ne.s32.totalorder %s191_s27, %s257_s28  ;;  %p262_p9 = scmp.lt.s32.totalorder %s191_s27, %s191_s27 }
  0x1a   :  { %v32_v10 = vadd.s32 8, %v31_v4  ;;  %v33_v17 = vadd.s32 16, %v31_v4  ;;  %p263_p10 = scmp.lt.s32.totalorder %s261_s29, %s257_s28 }
  0x1b   :  { %v37_v13 = vrot.slane %v29_v11, %v36_v6  ;;  %v53_v14 = vrot.slane %v29_v11, %v52_v7  ;;  %v69_v15 = vrot.slane %v29_v11, %v68_v8  ;;  %v85_v16 = vrot.slane %v29_v11, %v84_v9 }
  0x1c   :  { %p264_p11 = por %p263_p10, %p262_p9 }
  0x1d   :  { %vm38_vm1 = vcmp.eq.s32.totalorder %v37_v13, %v31_v4  ;;  %vm39_vm2 = vcmp.eq.s32.totalorder %v37_v13, %v32_v10  ;;  %vm54_vm3 = vcmp.eq.s32.totalorder %v53_v14, %v31_v4  ;;  %vm55_vm4 = vcmp.eq.s32.totalorder %v53_v14, %v32_v10 }
  0x1e   :  { %v199_v18 = vsel %vm38_vm1, 1.0, %v286_v3  ;;  %v200_v19 = vsel %vm39_vm2, 1.0, %v286_v3  ;;  %v202_v20 = vsel %vm54_vm3, 1.0, %v286_v3  ;;  %v203_v21 = vsel %vm55_vm4, 1.0, %v286_v3  ;;  %p265_p12 = pnand %p264_p11, %p258_p8 }
  0x1f   :  { %v63_v22 = vadd.f32 %v202_v20, %v199_v18  ;;  %v64_v23 = vadd.f32 %v203_v21, %v200_v19  ;;  %vm70_vm5 = vcmp.eq.s32.totalorder %v69_v15, %v31_v4  ;;  %vm71_vm6 = vcmp.eq.s32.totalorder %v69_v15, %v32_v10 }
  0x20   :  { %v205_v24 = vsel %vm70_vm5, 1.0, %v286_v3  ;;  %v206_v25 = vsel %vm71_vm6, 1.0, %v286_v3  ;;  %vm86_vm7 = vcmp.eq.s32.totalorder %v85_v16, %v31_v4  ;;  %vm87_vm8 = vcmp.eq.s32.totalorder %v85_v16, %v32_v10 }
  0x21   :  { %v79_v26 = vadd.f32 %v205_v24, %v63_v22  ;;  %v80_v27 = vadd.f32 %v206_v25, %v64_v23  ;;  %v208_v28 = vsel %vm86_vm7, 1.0, %v286_v3  ;;  %v209_v29 = vsel %vm87_vm8, 1.0, %v286_v3 }
  0x22   :  { %vm40_vm9 = vcmp.eq.s32.totalorder %v37_v13, %v33_v17  ;;  %vm56_vm10 = vcmp.eq.s32.totalorder %v53_v14, %v33_v17  ;;  %vm72_vm11 = vcmp.eq.s32.totalorder %v69_v15, %v33_v17  ;;  %vm88_vm12 = vcmp.eq.s32.totalorder %v85_v16, %v33_v17 }
  0x23   :  { %v95_v30 = vadd.f32 %v208_v28, %v79_v26  ;;  %v96_v31 = vadd.f32 %v209_v29, %v80_v27  ;;  %v201_v32 = vsel %vm40_vm9, 1.0, %v286_v3  ;;  %v204_v33 = vsel %vm56_vm10, 1.0, %v286_v3 }
  0x24   :  { %v65_v34 = vadd.f32 %v204_v33, %v201_v32  ;;  %v207_v35 = vsel %vm72_vm11, 1.0, %v286_v3  ;;  %v210_v37 = vsel %vm88_vm12, 1.0, %v286_v3 }
  0x25   :  { %v226_v36 = vpack.c.bf16 %v96_v31, %v95_v30 }
  0x26   :  { %v81_v38 = vadd.f32 %v207_v35, %v65_v34 }
  0x27   :  { %227 = vmatpush3.bf16.msra.mxu0 %v226_v36 }
  0x28   :  { %220 = vmatprep.subr.mxu0 %v286_v3  ;;  %v97_v39 = vadd.f32 %v210_v37, %v81_v38 }
  0x2b   :  { %221 = vmatpush3.msra.mxu0 %v97_v39 }
  0x2c   :  { %223 = vmatmul.mubr.msk.f32.vlgmr.msra.gmra.mrb[0].mxu0 %vm109_vm13, %v98_v40 }
  0x97   :  { %v103_v41 = vpop.permute.xlu0 %102 }
  0x98   :  { %v108_v42 = vrot.slane %v103_v41, %v36_v6 }
  0xff   :  { %v179_v43 = vpop.f32.mrb[0].mxu0 }
 0x100   :  { %v180_v44 = vadd.f32 %v179_v43, %v108_v42  ;;  %v224_v45 = vpop.f32.mrb[1].mxu0 }
 0x102   :  { %183 = vst [vmem:[#allocation6] sm:$0x1] %v180_v44 }
 0x103   :  { %268 = shalt.err (!%p265_p12)
}
 0x104   :  { %s269_s4 = scalar_lea.hbm %s342_s3, 16 }
 0x105   :  { %p270_p13 = scmp.ne.s32.totalorder %s342_s3, %s269_s4  ;;  %p273_p0 = scmp.lt.u32.totalorder %s269_s4, %s342_s3 }
 0x107   :  { %p275_p1 = pnand %p273_p0, %p270_p13 }
 0x109   :  { %278 = shalt.err (!%p275_p1)
}
 0x10a   :  { %193 = dma.vmem_to_hbm [thread:$0]  %s191_s27, 16, %s342_s3, [#allocation5]  }
 0x10b   :  { %281 = dma.done.wait [#allocation5], 16  }
 0x10c   :  { %282 = vsyncadd [#allocation5], 4294967280 }
 0x10d   :  { %197 = vsyncpa [#allocation4], 1 }
 0x10e   :  { %198 = vsyncpa [#allocation5], 1 }

</bundles_post_ra>
